<compile_context>
chip_gen: v7x
topology: tpu7x:2x2x1
jax: 0.10.0
libtpu: 0.0.40
codegen_flags: <defaults>
</compile_context>

<pallas_src>
import functools

import jax
import jax.numpy as jnp
from jax import lax
from jax.experimental import pallas as pl
from jax.experimental.pallas import tpu as pltpu


def _entropy_loss_kernel(x_ref, o_ref, *, rem, tile_b):
    # x_ref: (TB, C) block in VMEM; o_ref: (1, 1) f32 per-tile partial in SMEM.
    x = x_ref[...].astype(jnp.float32)                    # (TB, C)

    # Numerically-stable reduction form of sum_c softmax*log_softmax:
    #   with z = x - rowmax(x), ez = exp(z):
    #   sum_c p*logp = sum_c(ez*z) / sum_c(ez) - log(sum_c(ez))
    m = jnp.max(x, axis=1, keepdims=True)                 # (TB, 1)  XLU
    z = x - m                                             # VPU
    ez = jnp.exp(z)                                       # EUP
    s_ez = jnp.sum(ez, axis=1, keepdims=True)             # (TB, 1)  XLU
    s_ezz = jnp.sum(ez * z, axis=1, keepdims=True)        # (TB, 1)  XLU
    row = s_ezz / s_ez - jnp.log(s_ez)                    # (TB, 1)

    if rem == 0:
        # B divides tile_b exactly (known at trace time): no masking anywhere.
        o_ref[0, 0] = jnp.sum(row)
    else:
        is_last = pl.program_id(0) == pl.num_programs(0) - 1

        @pl.when(is_last)
        def _():
            # Only the last tile has padding rows; garbage rows may be NaN but
            # rows are independent, so the select fully removes them.
            ridx = lax.broadcasted_iota(jnp.int32, (tile_b, 1), 0)
            o_ref[0, 0] = jnp.sum(jnp.where(ridx < rem, row, jnp.float32(0.0)))

        @pl.when(jnp.logical_not(is_last))
        def _():
            o_ref[0, 0] = jnp.sum(row)


def _min_sublane(dtype) -> int:
    # Minimum second-to-last tile dim before the in-kernel cast to f32.
    itemsize = jnp.dtype(dtype).itemsize
    return max(8, 32 // itemsize)          # 8 (f32) / 16 (bf16) / 32 (int8/fp8)


def entropy_loss(x, *, tile_b=None):
    """Pallas implementation of EntropyLoss.forward for (B, C) logits."""
    B, C = x.shape
    itemsize = jnp.dtype(x.dtype).itemsize
    sub = _min_sublane(x.dtype)
    padded_c = pl.cdiv(C, 128) * 128       # last dim is lane-padded to 128

    # Generation-aware VMEM budget (v5e/v6e: 128 MiB, v7x: 64 MiB per TC).
    try:
        vmem_cap = int(pltpu.get_tpu_info().vmem_capacity_bytes)
    except Exception:
        vmem_cap = 64 << 20                 # conservative fallback (v7x level)

    if tile_b is None:
        # Per-row footprint: double-buffered input + ~5 f32-tile temporaries
        # (cast, z, ez, ez*z, slack).  Budget ~50% of VMEM, leave headroom.
        per_row = 2 * padded_c * itemsize + 5 * padded_c * 4
        tile_b = max(sub, (vmem_cap // 2) // per_row)
    tile_b = min(tile_b, B)
    if tile_b < B:
        tile_b = max(sub, (tile_b // sub) * sub)   # keep sublane alignment
    # (tile_b == B is always legal: block equals the full array dims.)

    grid_size = pl.cdiv(B, tile_b)
    rem = B % tile_b
    kernel = functools.partial(_entropy_loss_kernel, rem=rem, tile_b=tile_b)

    # Raise the scoped-VMEM limit (v5e default 16 MiB / v6e 32 MiB are too
    # small for roofline-sized tiles); stay well under physical capacity.
    vmem_limit = min(int(vmem_cap * 0.75), 100 << 20)

    cost = pl.CostEstimate(
        flops=5 * B * C,
        transcendentals=B * C + 2 * B,
        bytes_accessed=B * C * itemsize + grid_size * 4 + 4,
    )

    partials = pl.pallas_call(
        kernel,
        out_shape=jax.ShapeDtypeStruct((grid_size, 1), jnp.float32),
        grid=(grid_size,),
        in_specs=[pl.BlockSpec((tile_b, C), lambda i: (i, 0))],
        out_specs=pl.BlockSpec((1, 1), lambda i: (i, 0),
                               memory_space=pltpu.SMEM),
        compiler_params=pltpu.CompilerParams(
            dimension_semantics=("parallel",),   # v7x: shard tiles over 2 TCs
            vmem_limit_bytes=vmem_limit,
        ),
        cost_estimate=cost,
    )(x)

    return jnp.sum(partials) / jnp.float32(B)


def entropy_loss_ref(x):
    # Pure-JAX reference mirroring the PyTorch module exactly.
    xf = x.astype(jnp.float32)
    b = jax.nn.softmax(xf, axis=1) * jax.nn.log_softmax(xf, axis=1)
    return jnp.sum(b) / x.shape[0]


if __name__ == "__main__":
    key = jax.random.PRNGKey(0)

    # Main test: small logits batch (batch=8, num_classes=32) — single tile.
    B, C = 8, 32
    x = jax.random.normal(key, (B, C), dtype=jnp.float32)
    out = jax.block_until_ready(entropy_loss(x))
    ref = entropy_loss_ref(x)
    assert jnp.allclose(out, ref, atol=1e-4, rtol=1e-4), (out, ref)

    # Secondary test: exercises per-tile partial sums + gated padded-row mask
    # (B=20 rows, TB=8 -> 3 grid steps, last tile only partially valid).
    x2 = jax.random.normal(jax.random.PRNGKey(1), (20, C), dtype=jnp.float32)
    out2 = jax.block_until_ready(entropy_loss(x2, tile_b=8))
    ref2 = entropy_loss_ref(x2)
    assert jnp.allclose(out2, ref2, atol=1e-4, rtol=1e-4), (out2, ref2)

    print("KERNEL_OK")
</pallas_src>

<mosaic_0001>
module attributes {stable_mosaic.version = 11 : i64} {
  func.func @_entropy_loss_kernel(%arg0: i32, %arg1: memref<8x32xf32, #tpu.memory_space<vmem>>, %arg2: memref<1x1xf32, #tpu.memory_space<smem>>) attributes {dimension_semantics = [#tpu.dimension_semantics<parallel>], iteration_bounds = array<i64: 1>, scalar_prefetch = 0 : i64, scratch_operands = 0 : i64, tpu.core_type = #tpu.core_type<tc>, window_params = [{transform_indices = @transform_0, window_bounds = array<i64: 8, 32>}, {transform_indices = @transform_1, window_bounds = array<i64: 1, 1>}]} {
    %c0 = arith.constant 0 : index
    %c0_0 = arith.constant 0 : index
    %0 = vector.load %arg1[%c0, %c0_0] : memref<8x32xf32, #tpu.memory_space<vmem>>, vector<8x32xf32>
    %cst = arith.constant dense<0xFF800000> : vector<8xf32>
    %1 = vector.multi_reduction <maximumf>, %0, %cst [1] : vector<8x32xf32> to vector<8xf32>
    %2 = vector.shape_cast %1 : vector<8xf32> to vector<8x1xf32>
    %3 = vector.broadcast %2 : vector<8x1xf32> to vector<8x32xf32>
    %4 = arith.subf %0, %3 : vector<8x32xf32>
    %5 = math.exp %4 : vector<8x32xf32>
    %cst_1 = arith.constant dense<0.000000e+00> : vector<8xf32>
    %6 = vector.multi_reduction <add>, %5, %cst_1 [1] : vector<8x32xf32> to vector<8xf32>
    %7 = vector.shape_cast %6 : vector<8xf32> to vector<8x1xf32>
    %8 = arith.mulf %5, %4 : vector<8x32xf32>
    %cst_2 = arith.constant dense<0.000000e+00> : vector<8xf32>
    %9 = vector.multi_reduction <add>, %8, %cst_2 [1] : vector<8x32xf32> to vector<8xf32>
    %10 = vector.shape_cast %9 : vector<8xf32> to vector<8x1xf32>
    %11 = arith.divf %10, %7 : vector<8x1xf32>
    %12 = math.log %7 : vector<8x1xf32>
    %13 = arith.subf %11, %12 : vector<8x1xf32>
    %14 = vector.shape_cast %13 : vector<8x1xf32> to vector<1x8x1xf32>
    %cst_3 = arith.constant dense<0.000000e+00> : vector<1xf32>
    %15 = vector.multi_reduction <add>, %14, %cst_3 [1, 2] : vector<1x8x1xf32> to vector<1xf32>
    %16 = vector.shape_cast %15 : vector<1xf32> to vector<1x1x1xf32>
    %17 = vector.extract %16[0, 0, 0] : f32 from vector<1x1x1xf32>
    %c0_4 = arith.constant 0 : index
    %c0_5 = arith.constant 0 : index
    %18 = memref.load %arg2[%c0_4, %c0_5] : memref<1x1xf32, #tpu.memory_space<smem>>
    memref.store %17, %arg2[%c0_4, %c0_5] : memref<1x1xf32, #tpu.memory_space<smem>>
    return
  }
  func.func @transform_0(%arg0: i32) -> (i32, i32) {
    %c0_i32 = arith.constant 0 : i32
    %c0_i32_0 = arith.constant 0 : i32
    return %arg0, %c0_i32 : i32, i32
  }
  func.func @transform_1(%arg0: i32) -> (i32, i32) {
    %c0_i32 = arith.constant 0 : i32
    %c0_i32_0 = arith.constant 0 : i32
    return %arg0, %c0_i32 : i32, i32
  }
}

</mosaic_0001>

<bundles_post_ra>
// kernel: tpu_custom_call.1
= control target key start
LH: loop header
LB: loop body
LE: loop exit
PB: predicated region body
PF: predicated region fallthrough
CT: control target
= control target key end

     0   :  { %6 = vsyncpa [#allocation3], 0  ;;  %s150_s0 = inlined_call_operand.hbm [shape: f32[8,32], index: 0, kind: input, shape index: {}]   ;;  %s151_s1 = inlined_call_operand.hbm [shape: f32[1,1], index: 1, kind: output, shape index: {}]  }
   0x1   :  { %7 = vsyncpa [#allocation4], 0  ;;  %s114_s6 = smov [#allocation2]   ;;  %s78_s10 = scalar_lea.hbm %s150_s0, 128 }
   0x2   :  { %s14_s7 = sshll.u32 %s114_s6, 4  ;;  %p79_p0 = scmp.ne.s32.totalorder %s150_s0, %s78_s10  ;;  %s15_s7 = int_to_ptr.vmem [resolvable:$true] %s14_s7 }
   0x3   :  { %p82_p1 = scmp.lt.u32.totalorder %s78_s10, %s150_s0 }
   0x5   :  { %p84_p2 = pnand %p82_p1, %p79_p0 }
   0x7   :  { %87 = shalt.err (!%p84_p2)
}
   0x8   :  { %s88_s15 = scalar_lea.vmem %s15_s7, 128  ;;  %p93_p4 = scmp.lt.s32.totalorder %s15_s7, %s15_s7 }
   0x9   :  { %p89_p3 = scmp.ne.s32.totalorder %s15_s7, %s88_s15  ;;  %p94_p5 = scmp.lt.s32.totalorder %s88_s15, %s88_s15 }
   0xb   :  { %p95_p6 = por %p94_p5, %p93_p4 }
   0xd   :  { %p96_p7 = pnand %p95_p6, %p89_p3 }
   0xf   :  { %99 = shalt.err (!%p96_p7)
}
  0x10   :  { %17 = dma.hbm_to_vmem [thread:$0]  %s150_s0, 128, %s15_s7, [#allocation3]  }
  0x11   :  { %110 = dma.done.wait [#allocation3], 128  }
  0x12   :  { %111 = vsyncadd [#allocation3], 4294967168  ;;  %vm22_vm0 = vcmask 261120   ;;  %v21_v0 = vld [vmem:[#allocation2] sm:$0xff]  ;;  %vm41_vm1 = vcmask 7168   ;;  %s100_s20 = scalar_lea.hbm %s151_s1, 16 }
  0x13   :  { %v23_v1 = vsel %vm22_vm0, %v21_v0, -inf  ;;  %p101_p8 = scmp.ne.s32.totalorder %s151_s1, %s100_s20  ;;  %p104_p9 = scmp.lt.u32.totalorder %s100_s20, %s151_s1 }
  0x14   :  { %24 = vmax.xlane.f32.xlu0 %v23_v1 }
  0x15   :  { %p106_p10 = pnand %p104_p9, %p101_p8 }
  0xa1   :  { %v25_v2 = vpop.xlane.xlu0 %24 }
  0xa2   :  { %v26_v3 = vsub.f32 %v21_v0, %v25_v2 }
  0xa4   :  { %v27_v4 = vmul.f32 1.442695, %v26_v3 }
  0xa6   :  { %72 = vpow2.f32 %v27_v4 }
  0xb0   :  { %v73_v5 = vpop.eup %72 }
  0xb1   :  { %v29_v6 = vsel %vm22_vm0, %v73_v5, 0.0  ;;  %v32_v7 = vmul.f32 %v73_v5, %v26_v3 }
  0xb2   :  { %30 = vadd.xlane.f32.xlu0 %v29_v6 }
  0xb3   :  { %v33_v8 = vsel %vm22_vm0, %v32_v7, 0.0 }
  0xb4   :  { %34 = vadd.xlane.f32.xlu1 %v33_v8 }
 0x13f   :  { %v31_v9 = vpop.xlane.xlu0 %30 }
 0x140   :  { %74 = vrcp.f32 %v31_v9 }
 0x141   :  { %76 = vlog2.f32 %v31_v9  ;;  %v35_v11 = vpop.xlane.xlu1 %34 }
 0x14a   :  { %v75_v10 = vpop.eup %74 }
 0x14b   :  { %v77_v12 = vpop.eup %76  ;;  %v37_v13 = vmul.f32 %v75_v10, %v35_v11 }
 0x14c   :  { %v39_v14 = vmul.f32 0.6931472, %v77_v12 }
 0x14e   :  { %v40_v15 = vsub.f32 %v37_v13, %v39_v14 }
 0x150   :  { %v42_v16 = vsel %vm41_vm1, %v40_v15, 0.0 }
 0x151   :  { %43 = vadd.xlane.f32.xlu1 %v42_v16 }
 0x1de   :  { %v44_v17 = vpop.xlane.xlu1 %43 }
 0x1df   :  { %v45_v18 = vrot.slane %v44_v17, 4 }
 0x1e1   :  { %v46_v19 = vadd.f32 %v45_v18, %v44_v17 }
 0x1e3   :  { %v47_v20 = vrot.slane %v46_v19, 2 }
 0x1e5   :  { %v48_v21 = vadd.f32 %v47_v20, %v46_v19 }
 0x1e7   :  { %v49_v22 = vrot.slane %v48_v21, 1 }
 0x1e9   :  { %v50_v23 = vadd.f32 %v49_v22, %v48_v21 }
 0x1eb   :  { %68 = vpush %v50_v23 }
 0x21c   :  { %s69_s0 = spop %68 }
 0x21d   :  { %53 = sst [smem:[#allocation5]] %s69_s0 }
 0x21e   :  { %109 = shalt.err (!%p106_p10)
}
 0x21f   :  { %s115_s25 = smov [#allocation5]  }
 0x220   :  { %61 = dma.smem_to_hbm %s115_s25, 16, %s151_s1, [#allocation4]  }
 0x221   :  { %112 = dma.done.wait [#allocation4], 16  }
 0x222   :  { %113 = vsyncadd [#allocation4], 4294967280 }
 0x223   :  { %65 = sfence }
 0x224   :  { %66 = vsyncpa [#allocation3], 1 }
 0x225   :  { %67 = vsyncpa [#allocation4], 1 }

</bundles_post_ra>
